<compile_context>
chip_gen: v7x
topology: tpu7x:2x2x1
jax: 0.10.0
libtpu: 0.0.40
codegen_flags: <defaults>
</compile_context>

<pallas_src>
import jax
import jax.numpy as jnp
from jax.experimental import pallas as pl
from jax.experimental.pallas import tpu as pltpu

STATE_DIM = 24     # BipedalWalker-v3 observation dim
ACTION_DIM = 4     # BipedalWalker-v3 action dim
HIDDEN_DIMS = [512, 512, 256]

MAX_TILE_B = 2048  # per-tile batch rows (working set is only a few MiB)


def _round_up(x, m):
    return ((x + m - 1) // m) * m


def _cdiv(a, b):
    return -(-a // b)


def _pick_epilogue_dtype():
    """bf16 bias/ReLU epilogue on v6e/v7x (bf16 VPU); f32 on v5-class/older."""
    try:
        kind = jax.devices()[0].device_kind.lower()
    except Exception:
        return jnp.float32
    for tag in ("v2", "v3", "v4", "v5"):
        if tag in kind:
            return jnp.float32
    return jnp.bfloat16


EPI_DTYPE = _pick_epilogue_dtype()


def qnet_kernel(s_ref, a_ref,
                w1s_ref, w1a_ref, b1_ref,
                w2_ref, b2_ref,
                w3_ref, b3_ref,
                w4_ref, b4_ref,
                o_ref):
    """One batch tile of the whole network (weights resident in VMEM)."""
    # Layer 1: split matmul == cat([state, action]) @ W1 (f32, tiny K=28).
    acc = jnp.dot(s_ref[...], w1s_ref[...], preferred_element_type=jnp.float32)
    acc = acc + jnp.dot(a_ref[...], w1a_ref[...],
                        preferred_element_type=jnp.float32)
    h = jnp.maximum(acc.astype(EPI_DTYPE) + b1_ref[...], 0.0)
    h = h.astype(jnp.bfloat16)

    # Layer 2: bf16 operands, f32 MXU accumulation, EPI_DTYPE epilogue.
    acc = jnp.dot(h, w2_ref[...], preferred_element_type=jnp.float32)
    h = jnp.maximum(acc.astype(EPI_DTYPE) + b2_ref[...], 0.0)
    h = h.astype(jnp.bfloat16)

    # Layer 3.
    acc = jnp.dot(h, w3_ref[...], preferred_element_type=jnp.float32)
    h = jnp.maximum(acc.astype(EPI_DTYPE) + b3_ref[...], 0.0)

    # Layer 4 (out_features = 1): VPU mul + cross-lane reduce instead of a
    # 1/128-utilized MXU pass against a zero-padded weight tile.
    q = jnp.sum(h.astype(jnp.float32) * w4_ref[...], axis=-1, keepdims=True)
    o_ref[...] = q + b4_ref[...]


def init_params(key, state_dim=STATE_DIM, action_dim=ACTION_DIM,
                hidden_dims=HIDDEN_DIMS):
    """Synthetic init matching the PyTorch module's layer shapes.

    Hidden layers: uniform(-1/sqrt(fan_in), 1/sqrt(fan_in)) (torch default).
    Final layer:   uniform(-0.003, 0.003) for weight and bias.
    Weights are stored as [in, out] (transposed vs. nn.Linear).
    """
    params = []
    in_dim = state_dim + action_dim
    dims = list(hidden_dims) + [1]
    for i, out_dim in enumerate(dims):
        key, kw, kb = jax.random.split(key, 3)
        bound = 0.003 if i == len(dims) - 1 else 1.0 / (in_dim ** 0.5)
        w = jax.random.uniform(kw, (in_dim, out_dim), jnp.float32,
                               minval=-bound, maxval=bound)
        b = jax.random.uniform(kb, (out_dim,), jnp.float32,
                               minval=-bound, maxval=bound)
        params.append((w, b))
        in_dim = out_dim
    return params


def prepare_params(params, state_dim=STATE_DIM):
    """One-time prep (outside the hot path): split W1 into state/action parts,
    cast big weights to bf16, biases to the epilogue dtype as [1, H], and keep
    the final layer as a single f32 row [1, H3] plus scalar bias [1, 1]."""
    (w1, b1), (w2, b2), (w3, b3), (w4, b4) = params

    return (w1[:state_dim, :].astype(jnp.float32),
            w1[state_dim:, :].astype(jnp.float32),
            b1.reshape(1, -1).astype(EPI_DTYPE),
            w2.astype(jnp.bfloat16),
            b2.reshape(1, -1).astype(EPI_DTYPE),
            w3.astype(jnp.bfloat16),
            b3.reshape(1, -1).astype(EPI_DTYPE),
            w4.reshape(1, -1).astype(jnp.float32),   # [1, 256] row
            b4.reshape(1, 1).astype(jnp.float32))    # [1, 1]


@jax.jit
def qnetwork_forward(state, action, prepared):
    """state: [B, state_dim], action: [B, action_dim] -> q: [B, 1]."""
    (w1s, w1a, b1, w2, b2, w3, b3, w4, b4) = prepared
    state = state.astype(jnp.float32)
    action = action.astype(jnp.float32)

    B, S = state.shape
    A = action.shape[1]
    H1 = w1s.shape[1]
    H2 = w2.shape[1]
    H3 = w3.shape[1]

    # Near-equal batch tiles with minimal padding; >= 2 tiles whenever B >= 16
    # so the batch axis can shard across v7x's two TensorCores.
    nt = max(_cdiv(B, MAX_TILE_B), 2 if B >= 16 else 1)
    tile_b = _round_up(_cdiv(B, nt), 8)
    b_pad = _round_up(B, tile_b)
    if b_pad != B:
        state = jnp.pad(state, ((0, b_pad - B), (0, 0)))
        action = jnp.pad(action, ((0, b_pad - B), (0, 0)))
    grid = b_pad // tile_b

    def batch_spec(cols):
        return pl.BlockSpec((tile_b, cols), lambda i: (i, 0))

    def const_spec(shape):
        return pl.BlockSpec(shape, lambda i: (0, 0))

    q = pl.pallas_call(
        qnet_kernel,
        grid=(grid,),
        out_shape=jax.ShapeDtypeStruct((b_pad, 1), jnp.float32),
        in_specs=[
            batch_spec(S),            # state tile
            batch_spec(A),            # action tile
            const_spec((S, H1)),      # W1_state (VMEM-resident across grid)
            const_spec((A, H1)),      # W1_action
            const_spec((1, H1)),      # b1
            const_spec((H1, H2)),     # W2 (bf16)
            const_spec((1, H2)),      # b2
            const_spec((H2, H3)),     # W3 (bf16)
            const_spec((1, H3)),      # b3
            const_spec((1, H3)),      # W4 row (f32)
            const_spec((1, 1)),       # b4
        ],
        out_specs=pl.BlockSpec((tile_b, 1), lambda i: (i, 0)),
        compiler_params=pltpu.CompilerParams(
            dimension_semantics=("parallel",),
            vmem_limit_bytes=48 * 1024 * 1024),
    )(state, action, w1s, w1a, b1, w2, b2, w3, b3, w4, b4)

    return q[:B]


def _reference_matched(state, action, prepared):
    """Pure-JAX reference using the same mixed precision as the kernel."""
    (w1s, w1a, b1, w2, b2, w3, b3, w4, b4) = prepared
    acc = (state.astype(jnp.float32) @ w1s
           + action.astype(jnp.float32) @ w1a)
    h = jnp.maximum(acc.astype(EPI_DTYPE) + b1, 0.0).astype(jnp.bfloat16)
    acc = jnp.dot(h, w2, preferred_element_type=jnp.float32)
    h = jnp.maximum(acc.astype(EPI_DTYPE) + b2, 0.0).astype(jnp.bfloat16)
    acc = jnp.dot(h, w3, preferred_element_type=jnp.float32)
    h = jnp.maximum(acc.astype(EPI_DTYPE) + b3, 0.0)
    q = jnp.sum(h.astype(jnp.float32) * w4, axis=-1, keepdims=True) + b4
    return q


def _reference_f32(state, action, params):
    """Full-f32 reference matching the PyTorch module exactly."""
    x = jnp.concatenate([state, action], axis=-1).astype(jnp.float32)
    for i, (w, b) in enumerate(params):
        x = x @ w + b
        if i < len(params) - 1:
            x = jnp.maximum(x, 0.0)
    return x


if __name__ == "__main__":
    key = jax.random.PRNGKey(0)
    kp, ks, ka = jax.random.split(key, 3)

    params = init_params(kp)
    prepared = prepare_params(params)   # one-time split / reshape / bf16 cast

    # Primary small test (single tile).
    B = 8
    state = jax.random.normal(ks, (B, STATE_DIM), jnp.float32)
    action = jax.random.uniform(ka, (B, ACTION_DIM), jnp.float32,
                                minval=-1.0, maxval=1.0)

    q = jax.block_until_ready(qnetwork_forward(state, action, prepared))
    assert q.shape == (B, 1), q.shape

    q_ref = _reference_matched(state, action, prepared)
    assert jnp.allclose(q, q_ref, atol=2e-3, rtol=2e-3), (
        f"max diff vs matched ref {jnp.max(jnp.abs(q - q_ref))}")

    q_f32 = _reference_f32(state, action, params)
    assert jnp.allclose(q, q_f32, atol=2e-2, rtol=2e-2), (
        f"max diff vs f32 ref {jnp.max(jnp.abs(q - q_f32))}")

    # Second test exercising the batch grid (2 near-equal tiles + small pad).
    B2 = 600
    ks2, ka2 = jax.random.split(jax.random.PRNGKey(1))
    state2 = jax.random.normal(ks2, (B2, STATE_DIM), jnp.float32)
    action2 = jax.random.uniform(ka2, (B2, ACTION_DIM), jnp.float32,
                                 minval=-1.0, maxval=1.0)
    q2 = jax.block_until_ready(qnetwork_forward(state2, action2, prepared))
    assert q2.shape == (B2, 1), q2.shape
    q2_ref = _reference_matched(state2, action2, prepared)
    assert jnp.allclose(q2, q2_ref, atol=2e-3, rtol=2e-3), (
        f"max diff vs matched ref (B={B2}) {jnp.max(jnp.abs(q2 - q2_ref))}")

    print("KERNEL_OK")
</pallas_src>

<mosaic_0001>
module attributes {stable_mosaic.version = 11 : i64} {
  func.func @qnet_kernel(%arg0: i32, %arg1: memref<8x24xf32, #tpu.memory_space<vmem>>, %arg2: memref<8x4xf32, #tpu.memory_space<vmem>>, %arg3: memref<24x512xf32, #tpu.memory_space<vmem>>, %arg4: memref<4x512xf32, #tpu.memory_space<vmem>>, %arg5: memref<1x512xbf16, #tpu.memory_space<vmem>>, %arg6: memref<512x512xbf16, #tpu.memory_space<vmem>>, %arg7: memref<1x512xbf16, #tpu.memory_space<vmem>>, %arg8: memref<512x256xbf16, #tpu.memory_space<vmem>>, %arg9: memref<1x256xbf16, #tpu.memory_space<vmem>>, %arg10: memref<1x256xf32, #tpu.memory_space<vmem>>, %arg11: memref<1x1xf32, #tpu.memory_space<vmem>>, %arg12: memref<8x1xf32, #tpu.memory_space<vmem>>) attributes {dimension_semantics = [#tpu.dimension_semantics<parallel>], iteration_bounds = array<i64: 1>, scalar_prefetch = 0 : i64, scratch_operands = 0 : i64, tpu.core_type = #tpu.core_type<tc>, window_params = [{transform_indices = @transform_0, window_bounds = array<i64: 8, 24>}, {transform_indices = @transform_1, window_bounds = array<i64: 8, 4>}, {pipeline_mode = #tpu.pipeline_mode<synchronous>, transform_indices = @transform_2, window_bounds = array<i64: 24, 512>}, {pipeline_mode = #tpu.pipeline_mode<synchronous>, transform_indices = @transform_3, window_bounds = array<i64: 4, 512>}, {pipeline_mode = #tpu.pipeline_mode<synchronous>, transform_indices = @transform_4, window_bounds = array<i64: 1, 512>}, {pipeline_mode = #tpu.pipeline_mode<synchronous>, transform_indices = @transform_5, window_bounds = array<i64: 512, 512>}, {pipeline_mode = #tpu.pipeline_mode<synchronous>, transform_indices = @transform_6, window_bounds = array<i64: 1, 512>}, {pipeline_mode = #tpu.pipeline_mode<synchronous>, transform_indices = @transform_7, window_bounds = array<i64: 512, 256>}, {pipeline_mode = #tpu.pipeline_mode<synchronous>, transform_indices = @transform_8, window_bounds = array<i64: 1, 256>}, {pipeline_mode = #tpu.pipeline_mode<synchronous>, transform_indices = @transform_9, window_bounds = array<i64: 1, 256>}, {pipeline_mode = #tpu.pipeline_mode<synchronous>, transform_indices = @transform_10, window_bounds = array<i64: 1, 1>}, {transform_indices = @transform_11, window_bounds = array<i64: 8, 1>}]} {
    %c0 = arith.constant 0 : index
    %c0_0 = arith.constant 0 : index
    %0 = vector.load %arg1[%c0, %c0_0] : memref<8x24xf32, #tpu.memory_space<vmem>>, vector<8x24xf32>
    %c0_1 = arith.constant 0 : index
    %c0_2 = arith.constant 0 : index
    %1 = vector.load %arg3[%c0_1, %c0_2] : memref<24x512xf32, #tpu.memory_space<vmem>>, vector<24x512xf32>
    %cst = arith.constant dense<0.000000e+00> : vector<8x512xf32>
    %2 = tpu.matmul %0, %1, %cst {dimension_numbers = #tpu.dot_dimension_numbers<[1], [0], [0], [1], [0, 0, 1, 1], [], []>} : vector<8x24xf32>, vector<24x512xf32>, vector<8x512xf32> -> vector<8x512xf32>
    %c0_3 = arith.constant 0 : index
    %c0_4 = arith.constant 0 : index
    %3 = vector.load %arg2[%c0_3, %c0_4] : memref<8x4xf32, #tpu.memory_space<vmem>>, vector<8x4xf32>
    %c0_5 = arith.constant 0 : index
    %c0_6 = arith.constant 0 : index
    %4 = vector.load %arg4[%c0_5, %c0_6] : memref<4x512xf32, #tpu.memory_space<vmem>>, vector<4x512xf32>
    %cst_7 = arith.constant dense<0.000000e+00> : vector<8x512xf32>
    %5 = tpu.matmul %3, %4, %cst_7 {dimension_numbers = #tpu.dot_dimension_numbers<[1], [0], [0], [1], [0, 0, 1, 1], [], []>} : vector<8x4xf32>, vector<4x512xf32>, vector<8x512xf32> -> vector<8x512xf32>
    %6 = arith.addf %2, %5 : vector<8x512xf32>
    %7 = arith.truncf %6 : vector<8x512xf32> to vector<8x512xbf16>
    %c0_8 = arith.constant 0 : index
    %c0_9 = arith.constant 0 : index
    %8 = vector.load %arg5[%c0_8, %c0_9] : memref<1x512xbf16, #tpu.memory_space<vmem>>, vector<1x512xbf16>
    %9 = vector.broadcast %8 : vector<1x512xbf16> to vector<8x512xbf16>
    %10 = arith.addf %7, %9 : vector<8x512xbf16>
    %cst_10 = arith.constant 0.000000e+00 : bf16
    %11 = vector.broadcast %cst_10 : bf16 to vector<8x512xbf16>
    %12 = arith.maximumf %10, %11 : vector<8x512xbf16>
    %c0_11 = arith.constant 0 : index
    %c0_12 = arith.constant 0 : index
    %13 = vector.load %arg6[%c0_11, %c0_12] : memref<512x512xbf16, #tpu.memory_space<vmem>>, vector<512x512xbf16>
    %cst_13 = arith.constant dense<0.000000e+00> : vector<8x512xf32>
    %14 = tpu.matmul %12, %13, %cst_13 {dimension_numbers = #tpu.dot_dimension_numbers<[1], [0], [0], [1], [0, 0, 1, 1], [], []>} : vector<8x512xbf16>, vector<512x512xbf16>, vector<8x512xf32> -> vector<8x512xf32>
    %15 = arith.truncf %14 : vector<8x512xf32> to vector<8x512xbf16>
    %c0_14 = arith.constant 0 : index
    %c0_15 = arith.constant 0 : index
    %16 = vector.load %arg7[%c0_14, %c0_15] : memref<1x512xbf16, #tpu.memory_space<vmem>>, vector<1x512xbf16>
    %17 = vector.broadcast %16 : vector<1x512xbf16> to vector<8x512xbf16>
    %18 = arith.addf %15, %17 : vector<8x512xbf16>
    %cst_16 = arith.constant 0.000000e+00 : bf16
    %19 = vector.broadcast %cst_16 : bf16 to vector<8x512xbf16>
    %20 = arith.maximumf %18, %19 : vector<8x512xbf16>
    %c0_17 = arith.constant 0 : index
    %c0_18 = arith.constant 0 : index
    %21 = vector.load %arg8[%c0_17, %c0_18] : memref<512x256xbf16, #tpu.memory_space<vmem>>, vector<512x256xbf16>
    %cst_19 = arith.constant dense<0.000000e+00> : vector<8x256xf32>
    %22 = tpu.matmul %20, %21, %cst_19 {dimension_numbers = #tpu.dot_dimension_numbers<[1], [0], [0], [1], [0, 0, 1, 1], [], []>} : vector<8x512xbf16>, vector<512x256xbf16>, vector<8x256xf32> -> vector<8x256xf32>
    %23 = arith.truncf %22 : vector<8x256xf32> to vector<8x256xbf16>
    %c0_20 = arith.constant 0 : index
    %c0_21 = arith.constant 0 : index
    %24 = vector.load %arg9[%c0_20, %c0_21] : memref<1x256xbf16, #tpu.memory_space<vmem>>, vector<1x256xbf16>
    %25 = vector.broadcast %24 : vector<1x256xbf16> to vector<8x256xbf16>
    %26 = arith.addf %23, %25 : vector<8x256xbf16>
    %cst_22 = arith.constant 0.000000e+00 : bf16
    %27 = vector.broadcast %cst_22 : bf16 to vector<8x256xbf16>
    %28 = arith.maximumf %26, %27 : vector<8x256xbf16>
    %29 = arith.extf %28 : vector<8x256xbf16> to vector<8x256xf32>
    %c0_23 = arith.constant 0 : index
    %c0_24 = arith.constant 0 : index
    %30 = vector.load %arg10[%c0_23, %c0_24] : memref<1x256xf32, #tpu.memory_space<vmem>>, vector<1x256xf32>
    %31 = vector.broadcast %30 : vector<1x256xf32> to vector<8x256xf32>
    %32 = arith.mulf %29, %31 : vector<8x256xf32>
    %cst_25 = arith.constant dense<0.000000e+00> : vector<8xf32>
    %33 = vector.multi_reduction <add>, %32, %cst_25 [1] : vector<8x256xf32> to vector<8xf32>
    %34 = vector.shape_cast %33 : vector<8xf32> to vector<8x1xf32>
    %c0_26 = arith.constant 0 : index
    %c0_27 = arith.constant 0 : index
    %35 = vector.load %arg11[%c0_26, %c0_27] : memref<1x1xf32, #tpu.memory_space<vmem>>, vector<1x1xf32>
    %36 = vector.broadcast %35 : vector<1x1xf32> to vector<8x1xf32>
    %37 = arith.addf %34, %36 : vector<8x1xf32>
    %c0_28 = arith.constant 0 : index
    %c0_29 = arith.constant 0 : index
    %38 = vector.load %arg12[%c0_28, %c0_29] : memref<8x1xf32, #tpu.memory_space<vmem>>, vector<8x1xf32>
    tpu.vector_store %arg12[%c0_28, %c0_29], %37 {strides = array<i32>} : memref<8x1xf32, #tpu.memory_space<vmem>>, vector<8x1xf32>,
    return
  }
  func.func @transform_0(%arg0: i32) -> (i32, i32) {
    %c0_i32 = arith.constant 0 : i32
    %c0_i32_0 = arith.constant 0 : i32
    return %arg0, %c0_i32 : i32, i32
  }
  func.func @transform_1(%arg0: i32) -> (i32, i32) {
    %c0_i32 = arith.constant 0 : i32
    %c0_i32_0 = arith.constant 0 : i32
    return %arg0, %c0_i32 : i32, i32
  }
  func.func @transform_2(%arg0: i32) -> (i32, i32) {
    %c0_i32 = arith.constant 0 : i32
    %c0_i32_0 = arith.constant 0 : i32
    %c0_i32_1 = arith.constant 0 : i32
    return %c0_i32, %c0_i32_0 : i32, i32
  }
  func.func @transform_3(%arg0: i32) -> (i32, i32) {
    %c0_i32 = arith.constant 0 : i32
    %c0_i32_0 = arith.constant 0 : i32
    %c0_i32_1 = arith.constant 0 : i32
    return %c0_i32, %c0_i32_0 : i32, i32
  }
  func.func @transform_4(%arg0: i32) -> (i32, i32) {
    %c0_i32 = arith.constant 0 : i32
    %c0_i32_0 = arith.constant 0 : i32
    %c0_i32_1 = arith.constant 0 : i32
    return %c0_i32, %c0_i32_0 : i32, i32
  }
  func.func @transform_5(%arg0: i32) -> (i32, i32) {
    %c0_i32 = arith.constant 0 : i32
    %c0_i32_0 = arith.constant 0 : i32
    %c0_i32_1 = arith.constant 0 : i32
    return %c0_i32, %c0_i32_0 : i32, i32
  }
  func.func @transform_6(%arg0: i32) -> (i32, i32) {
    %c0_i32 = arith.constant 0 : i32
    %c0_i32_0 = arith.constant 0 : i32
    %c0_i32_1 = arith.constant 0 : i32
    return %c0_i32, %c0_i32_0 : i32, i32
  }
  func.func @transform_7(%arg0: i32) -> (i32, i32) {
    %c0_i32 = arith.constant 0 : i32
    %c0_i32_0 = arith.constant 0 : i32
    %c0_i32_1 = arith.constant 0 : i32
    return %c0_i32, %c0_i32_0 : i32, i32
  }
  func.func @transform_8(%arg0: i32) -> (i32, i32) {
    %c0_i32 = arith.constant 0 : i32
    %c0_i32_0 = arith.constant 0 : i32
    %c0_i32_1 = arith.constant 0 : i32
    return %c0_i32, %c0_i32_0 : i32, i32
  }
  func.func @transform_9(%arg0: i32) -> (i32, i32) {
    %c0_i32 = arith.constant 0 : i32
    %c0_i32_0 = arith.constant 0 : i32
    %c0_i32_1 = arith.constant 0 : i32
    return %c0_i32, %c0_i32_0 : i32, i32
  }
  func.func @transform_10(%arg0: i32) -> (i32, i32) {
    %c0_i32 = arith.constant 0 : i32
    %c0_i32_0 = arith.constant 0 : i32
    %c0_i32_1 = arith.constant 0 : i32
    return %c0_i32, %c0_i32_0 : i32, i32
  }
  func.func @transform_11(%arg0: i32) -> (i32, i32) {
    %c0_i32 = arith.constant 0 : i32
    %c0_i32_0 = arith.constant 0 : i32
    return %arg0, %c0_i32 : i32, i32
  }
}

</mosaic_0001>

<bundles_post_ra>
// kernel: qnetwork_forward.1
= control target key start
LH: loop header
LB: loop body
LE: loop exit
PB: predicated region body
PF: predicated region fallthrough
CT: control target
= control target key end

     0   :  { %s2814_s0 = inlined_call_operand.vmem [shape: f32[8,24], index: 0, kind: input, shape index: {}]   ;;  %s2815_s1 = inlined_call_operand.vmem [shape: f32[8,4], index: 1, kind: input, shape index: {}]   ;;  %s2816_s2 = inlined_call_operand.hbm [shape: f32[24,512], index: 2, kind: input, shape index: {}]   ;;  %s2817_s3 = inlined_call_operand.vmem [shape: f32[4,512], index: 3, kind: input, shape index: {}]   ;;  %s2818_s4 = inlined_call_operand.vmem [shape: bf16[1,512], index: 4, kind: input, shape index: {}]   ;;  %s2819_s5 = inlined_call_operand.hbm [shape: bf16[512,512], index: 5, kind: input, shape index: {}]   ;;  %s2820_s6 = inlined_call_operand.vmem [shape: bf16[1,512], index: 6, kind: input, shape index: {}]   ;;  %s2821_s7 = inlined_call_operand.hbm [shape: bf16[512,256], index: 7, kind: input, shape index: {}]   ;;  %s2822_s8 = inlined_call_operand.vmem [shape: bf16[1,256], index: 8, kind: input, shape index: {}]   ;;  %s2823_s9 = inlined_call_operand.vmem [shape: f32[1,256], index: 9, kind: input, shape index: {}]   ;;  %s2824_s10 = inlined_call_operand.<no memory space> [shape: f32[1,1], index: 10, kind: input, shape index: {}]   ;;  %s2825_s11 = inlined_call_operand.vmem [shape: f32[8,1], index: 11, kind: output, shape index: {}]  }
   0x1   :  { %v16_v0 = vstv %s2824_s10 }
   0x2   :  { %17 = vst [vmem:[#allocation2] sm:$0x1] %v16_v0 }
   0x3   :  { %18 = vsyncpa [#allocation4], 0 }
   0x4   :  { %19 = vsyncpa [#allocation6], 0  ;;  %s2610_s19 = smov [#allocation5]   ;;  %s2540_s23 = scalar_lea.hbm %s2819_s5, 16384 }
   0x5   :  { %s45_s20 = sshll.u32 %s2610_s19, 4  ;;  %p2541_p0 = scmp.ne.s32.totalorder %s2819_s5, %s2540_s23  ;;  %s46_s20 = int_to_ptr.vmem [resolvable:$true] %s45_s20 }
   0x6   :  { %p2544_p1 = scmp.lt.u32.totalorder %s2540_s23, %s2819_s5 }
   0x8   :  { %p2546_p2 = pnand %p2544_p1, %p2541_p0 }
   0xa   :  { %2549 = shalt.err (!%p2546_p2)
}
   0xb   :  { %s2550_s10 = scalar_lea.vmem %s46_s20, 16384  ;;  %p2555_p4 = scmp.lt.s32.totalorder %s46_s20, %s46_s20 }
   0xc   :  { %p2551_p3 = scmp.ne.s32.totalorder %s46_s20, %s2550_s10  ;;  %p2556_p5 = scmp.lt.s32.totalorder %s2550_s10, %s2550_s10 }
   0xe   :  { %p2557_p6 = por %p2556_p5, %p2555_p4 }
  0x10   :  { %p2558_p7 = pnand %p2557_p6, %p2551_p3 }
  0x12   :  { %2561 = shalt.err (!%p2558_p7)
}
  0x13   :  { %s2611_s28 = smov 256   ;;  %s2612_s29 = smov 16  }
  0x14   :  { %51 = dma.hbm_to_vmem [thread:$0]  %s2819_s5, 16384, %s46_s20, [#allocation6], %s2611_s28, %s2611_s28, %s2612_s29  }
  0x15   :  { %s2613_s13 = smov [#allocation3]   ;;  %s2562_s17 = scalar_lea.hbm %s2816_s2, 1536 }
  0x16   :  { %s29_s14 = sshll.u32 %s2613_s13, 4  ;;  %p2563_p8 = scmp.ne.s32.totalorder %s2816_s2, %s2562_s17  ;;  %s30_s14 = int_to_ptr.vmem [resolvable:$true] %s29_s14 }
  0x17   :  { %p2566_p9 = scmp.lt.u32.totalorder %s2562_s17, %s2816_s2 }
  0x19   :  { %p2568_p10 = pnand %p2566_p9, %p2563_p8 }
  0x1b   :  { %2571 = shalt.err (!%p2568_p10)
}
  0x1c   :  { %s2572_s23 = scalar_lea.vmem %s30_s14, 1536  ;;  %p2577_p12 = scmp.lt.s32.totalorder %s30_s14, %s30_s14 }
  0x1d   :  { %p2573_p11 = scmp.ne.s32.totalorder %s30_s14, %s2572_s23  ;;  %p2578_p13 = scmp.lt.s32.totalorder %s2572_s23, %s2572_s23 }
  0x1f   :  { %p2579_p0 = por %p2578_p13, %p2577_p12 }
  0x21   :  { %p2580_p1 = pnand %p2579_p0, %p2573_p11 }
  0x23   :  { %2583 = shalt.err (!%p2580_p1)
}
  0x24   :  { %s2614_s5 = smov 512   ;;  %s2615_s20 = smov 32  }
  0x25   :  { %35 = dma.hbm_to_vmem [thread:$0]  %s2816_s2, 1536, %s30_s14, [#allocation4], %s2614_s5, %s2614_s5, %s2615_s20  }
  0x26   :  { %s2616_s26 = smov [#allocation7]   ;;  %s2584_s29 = scalar_lea.hbm %s2821_s7, 8192 }
  0x27   :  { %s59_s27 = sshll.u32 %s2616_s26, 4  ;;  %p2585_p2 = scmp.ne.s32.totalorder %s2821_s7, %s2584_s29  ;;  %s60_s27 = int_to_ptr.vmem [resolvable:$true] %s59_s27 }
  0x28   :  { %p2588_p3 = scmp.lt.u32.totalorder %s2584_s29, %s2821_s7 }
  0x2a   :  { %p2590_p4 = pnand %p2588_p3, %p2585_p2 }
  0x2c   :  { %2593 = shalt.err (!%p2590_p4)
}
  0x2d   :  { %s2594_s16 = scalar_lea.vmem %s60_s27, 8192  ;;  %p2599_p6 = scmp.lt.s32.totalorder %s60_s27, %s60_s27 }
  0x2e   :  { %p2595_p5 = scmp.ne.s32.totalorder %s60_s27, %s2594_s16  ;;  %p2600_p7 = scmp.lt.s32.totalorder %s2594_s16, %s2594_s16 }
  0x30   :  { %p2601_p8 = por %p2600_p7, %p2599_p6 }
  0x32   :  { %p2602_p9 = pnand %p2601_p8, %p2595_p5 }
  0x34   :  { %2605 = shalt.err (!%p2602_p9)
}
  0x35   :  { %s2617_s2 = smov 128   ;;  %s2618_s14 = smov 8  }
  0x36   :  { %65 = dma.hbm_to_vmem [thread:$0]  %s2821_s7, 8192, %s60_s27, [#allocation6], %s2617_s2, %s2617_s2, %s2618_s14  }
  0x37   :  { %2606 = dma.done.wait [#allocation4], 1536  }
  0x38   :  { %2607 = vsyncadd [#allocation4], 4294965760 }
  0x39   :  { %2608 = dma.done.wait [#allocation6], 24576  }
  0x3a   :  { %2609 = vsyncadd [#allocation6], 4294942720  ;;  %v2619_v1 = vmov 0.0   ;;  %v96_v2 = vld [vmem:[%s2817_s3] sm:$0xff]  ;;  %vm106_vm0 = vcmask 1043456   ;;  %v97_v3 = vld [vmem:[%s2817_s3 + $0x8] sm:$0xff] }
  0x3b   :  { %179 = vmatprep.mubr.f32.mxu0 %v2619_v1  ;;  %250 = vmatprep.mubr.f32.mxu1 %v2619_v1  ;;  %v95_v4 = vld [vmem:[%s2815_s1] sm:$0xff]  ;;  %v100_v5 = vcombine.high %v96_v2, %v96_v2  ;;  %v101_v6 = vcombine.high %v97_v3, %v97_v3  ;;  %v84_v7 = vld [vmem:[#allocation3 + $0x8] sm:$0xff]  ;;  %vm102_vm1 = vcmask 31744   ;;  %v85_v16 = vld [vmem:[#allocation3 + $0x10] sm:$0xff]  ;;  %vm257_vm2 = vcmask 195584  }
  0x3c   :  { %v88_v8 = vld [vmem:[#allocation3 + $0x28] sm:$0xff]  ;;  %v83_v9 = vld [vmem:[#allocation3] sm:$0xff]  ;;  %v86_v12 = vld [vmem:[#allocation3 + $0x18] sm:$0xff]  ;;  %vm2004_vm3 = vcmask 7168  }
  0x3d   :  { %v2216_v10 = vpack.c.bf16 %v88_v8, %v84_v7  ;;  %v87_v11 = vld [vmem:[#allocation3 + $0x20] sm:$0xff]  ;;  %v90_v13 = vld [vmem:[#allocation3 + $0x38] sm:$0xff]  ;;  %2012 = vmatprep.subr.msk.mxu0 %vm106_vm0, %v100_v5  ;;  %2015 = vmatprep.subr.msk.mxu1 %vm106_vm0, %v101_v6  ;;  %v89_v17 = vld [vmem:[#allocation3 + $0x30] sm:$0xff] }
  0x3e   :  { %v2218_v14 = vpack.c.bf16 %v87_v11, %v83_v9  ;;  %v2220_v15 = vpack.c.bf16 %v90_v13, %v86_v12  ;;  %2013 = vmatpush1.msk.msra.mxu0 %vm106_vm0, %v96_v2  ;;  %2016 = vmatpush1.msk.msra.mxu1 %vm106_vm0, %v97_v3  ;;  %v2222_v18 = vpack.c.bf16 %v89_v17, %v85_v16  ;;  %v92_v19 = vld [vmem:[#allocation3 + $0x48] sm:$0xff]  ;;  %v94_v20 = vld [vmem:[#allocation3 + $0x58] sm:$0xff]  ;;  %v91_v21 = vld [vmem:[#allocation3 + $0x40] sm:$0xff] }
  0x3f   :  { %2014 = vmatmul.mubr.msk.f32.vlgmr.msra.gmra.mrb[0].mxu0 %vm102_vm1, %v95_v4  ;;  %2017 = vmatmul.mubr.msk.f32.vlgmr.msra.gmra.mrb[0].mxu1 %vm102_vm1, %v95_v4  ;;  %v93_v22 = vld [vmem:[#allocation3 + $0x50] sm:$0xff]  ;;  %v82_v25 = vld [vmem:[%s2814_s0] sm:$0xff] }
  0x40   :  { %2217 = vmatprep.subr.bf16.mxu0 %v2216_v10  ;;  %2221 = vmatprep.subr.bf16.mxu1 %v2220_v15  ;;  %v2254_v23 = vld [vmem:[#allocation5 + $0x4] ss:$16 sps:$4 sm:$0xff]   ;;  %v2252_v26 = vld [vmem:[#allocation5] ss:$16 sps:$4 sm:$0xff]  }
  0x41   :  { %2219 = vmatpush1.bf16.msra.mxu0 %v2218_v14  ;;  %2223 = vmatpush1.bf16.msra.mxu1 %v2222_v18  ;;  %v2257_v24 = vld [vmem:[#allocation5 + $0x204] ss:$16 sps:$4 sm:$0xff]   ;;  %v2255_v27 = vld [vmem:[#allocation5 + $0x200] ss:$16 sps:$4 sm:$0xff]  }
  0x42   :  { %265 = vmatprep.subr.mxu0 %v92_v19  ;;  %336 = vmatprep.subr.mxu1 %v94_v20  ;;  %v2260_v28 = vld [vmem:[#allocation5 + $0x24] ss:$16 sps:$4 sm:$0xff]   ;;  %v2258_v30 = vld [vmem:[#allocation5 + $0x20] ss:$16 sps:$4 sm:$0xff]  }
  0x43   :  { %325 = vmatprep.mubr.f32.mxu0 %v2619_v1  ;;  %396 = vmatprep.mubr.f32.mxu1 %v2619_v1  ;;  %v2263_v29 = vld [vmem:[#allocation5 + $0x224] ss:$16 sps:$4 sm:$0xff]   ;;  %v2261_v31 = vld [vmem:[#allocation5 + $0x220] ss:$16 sps:$4 sm:$0xff]  }
  0x44   :  { %v2266_v32 = vld [vmem:[#allocation5 + $0x44] ss:$16 sps:$4 sm:$0xff]   ;;  %v2264_v34 = vld [vmem:[#allocation5 + $0x40] ss:$16 sps:$4 sm:$0xff]  }
  0x45   :  { %266 = vmatpush1.msra.mxu0 %v91_v21  ;;  %337 = vmatpush1.msra.mxu1 %v93_v22  ;;  %v2269_v33 = vld [vmem:[#allocation5 + $0x244] ss:$16 sps:$4 sm:$0xff]   ;;  %v2267_v35 = vld [vmem:[#allocation5 + $0x240] ss:$16 sps:$4 sm:$0xff]  }
  0x46   :  { %1237 = vmatprep.subr.bf16.mxu1 %v2254_v23  ;;  %1278 = vmatprep.subr.bf16.mxu0 %v2257_v24  ;;  %v2272_v36 = vld [vmem:[#allocation5 + $0x64] ss:$16 sps:$4 sm:$0xff]   ;;  %v2270_v38 = vld [vmem:[#allocation5 + $0x60] ss:$16 sps:$4 sm:$0xff]   ;;  %v2350_v24 = vld [vmem:[#allocation5 + $0xc] ss:$16 sps:$4 sm:$0xff]  }
  0x47   :  { %2018 = vmatmul.mubr.msk.f32.vlgmr.msra.gmra.mrb[0].mxu0 %vm257_vm2, %v82_v25  ;;  %2019 = vmatmul.mubr.msk.f32.vlgmr.msra.gmra.mrb[0].mxu1 %vm257_vm2, %v82_v25  ;;  %v2275_v37 = vld [vmem:[#allocation5 + $0x264] ss:$16 sps:$4 sm:$0xff]   ;;  %v2273_v39 = vld [vmem:[#allocation5 + $0x260] ss:$16 sps:$4 sm:$0xff]   ;;  %v2620_v25 = vmov 1966171168  }
  0x48   :  { %1238 = vmatpush1.bf16.msra.mxu1 %v2252_v26  ;;  %1279 = vmatpush1.bf16.msra.mxu0 %v2255_v27  ;;  %v2278_v40 = vld [vmem:[#allocation5 + $0x84] ss:$16 sps:$4 sm:$0xff]   ;;  %v2276_v42 = vld [vmem:[#allocation5 + $0x80] ss:$16 sps:$4 sm:$0xff]   ;;  %v418_v26 = vunpack.c.l.s4 %v2620_v25  ;;  %v420_v27 = vlaneseq  ;;  %v2371_v25 = vld [vmem:[#allocation5 + $0xec] ss:$16 sps:$4 sm:$0xff]  }
  0x49   :  { %1239 = vmatprep.subr.bf16.mxu1 %v2260_v28  ;;  %1280 = vmatprep.subr.bf16.mxu0 %v2263_v29  ;;  %v2281_v41 = vld [vmem:[#allocation5 + $0x284] ss:$16 sps:$4 sm:$0xff]   ;;  %v2279_v43 = vld [vmem:[#allocation5 + $0x280] ss:$16 sps:$4 sm:$0xff]  }
  0x4a   :  { %v2284_v44 = vld [vmem:[#allocation5 + $0xa4] ss:$16 sps:$4 sm:$0xff]   ;;  %v2282_v46 = vld [vmem:[#allocation5 + $0xa0] ss:$16 sps:$4 sm:$0xff]   ;;  %v419_v28 = vunpack.c.0.s8 %v418_v26  ;;  %v2739_v29 = vshrl.u32 %v420_v27, 7 }
  0x4b   :  { %v2287_v45 = vld [vmem:[#allocation5 + $0x2a4] ss:$16 sps:$4 sm:$0xff]   ;;  %v2285_v47 = vld [vmem:[#allocation5 + $0x2a0] ss:$16 sps:$4 sm:$0xff]  }
  0x4c   :  { %1240 = vmatpush1.bf16.msra.mxu1 %v2258_v30  ;;  %1281 = vmatpush1.bf16.msra.mxu0 %v2261_v31  ;;  %v2290_v48 = vld [vmem:[#allocation5 + $0xc4] ss:$16 sps:$4 sm:$0xff]   ;;  %v2288_v50 = vld [vmem:[#allocation5 + $0xc0] ss:$16 sps:$4 sm:$0xff]   ;;  %v2745_v31 = vsub.s32 %v419_v28, %v2739_v29  ;;  %v2369_v28 = vld [vmem:[#allocation5 + $0xe8] ss:$16 sps:$4 sm:$0xff]  }
  0x4d   :  { %1241 = vmatprep.subr.bf16.mxu1 %v2266_v32  ;;  %1282 = vmatprep.subr.bf16.mxu0 %v2269_v33  ;;  %v2293_v49 = vld [vmem:[#allocation5 + $0x2c4] ss:$16 sps:$4 sm:$0xff]   ;;  %v2291_v51 = vld [vmem:[#allocation5 + $0x2c0] ss:$16 sps:$4 sm:$0xff]  }
  0x4e   :  { %v2296_v52 = vld [vmem:[#allocation5 + $0xe4] ss:$16 sps:$4 sm:$0xff]   ;;  %v2294_v54 = vld [vmem:[#allocation5 + $0xe0] ss:$16 sps:$4 sm:$0xff]  }
  0x4f   :  { %v2299_v53 = vld [vmem:[#allocation5 + $0x2e4] ss:$16 sps:$4 sm:$0xff]   ;;  %v2297_v55 = vld [vmem:[#allocation5 + $0x2e0] ss:$16 sps:$4 sm:$0xff]  }
  0x50   :  { %1242 = vmatpush1.bf16.msra.mxu1 %v2264_v34  ;;  %1283 = vmatpush1.bf16.msra.mxu0 %v2267_v35  ;;  %v2302_v56 = vld [vmem:[#allocation5 + $0x104] ss:$16 sps:$4 sm:$0xff]   ;;  %v2300_v58 = vld [vmem:[#allocation5 + $0x100] ss:$16 sps:$4 sm:$0xff]  }
  0x51   :  { %1243 = vmatprep.subr.bf16.mxu1 %v2272_v36  ;;  %1284 = vmatprep.subr.bf16.mxu0 %v2275_v37  ;;  %v2305_v57 = vld [vmem:[#allocation5 + $0x304] ss:$16 sps:$4 sm:$0xff]   ;;  %v2303_v59 = vld [vmem:[#allocation5 + $0x300] ss:$16 sps:$4 sm:$0xff]  }
  0x52   :  { %v2308_v60 = vld [vmem:[#allocation5 + $0x124] ss:$16 sps:$4 sm:$0xff]   ;;  %v2306_v62 = vld [vmem:[#allocation5 + $0x120] ss:$16 sps:$4 sm:$0xff]  }
  0x53   :  { %v2311_v61 = vld [vmem:[#allocation5 + $0x324] ss:$16 sps:$4 sm:$0xff]   ;;  %v2309_v63 = vld [vmem:[#allocation5 + $0x320] ss:$16 sps:$4 sm:$0xff]  }
  0x54   :  { %1244 = vmatpush1.bf16.msra.mxu1 %v2270_v38  ;;  %1285 = vmatpush1.bf16.msra.mxu0 %v2273_v39  ;;  %v2314_v0 = vld [vmem:[#allocation5 + $0x144] ss:$16 sps:$4 sm:$0xff]   ;;  %v2312_v2 = vld [vmem:[#allocation5 + $0x140] ss:$16 sps:$4 sm:$0xff]   ;;  %v2750_v38 = vsub.s32 0, %v2739_v29 }
  0x55   :  { %1245 = vmatprep.subr.bf16.mxu1 %v2278_v40  ;;  %1286 = vmatprep.subr.bf16.mxu0 %v2281_v41  ;;  %v2317_v1 = vld [vmem:[#allocation5 + $0x344] ss:$16 sps:$4 sm:$0xff]   ;;  %v2315_v3 = vld [vmem:[#allocation5 + $0x340] ss:$16 sps:$4 sm:$0xff]  }
  0x56   :  { %v2320_v4 = vld [vmem:[#allocation5 + $0x164] ss:$16 sps:$4 sm:$0xff]   ;;  %v2318_v6 = vld [vmem:[#allocation5 + $0x160] ss:$16 sps:$4 sm:$0xff]  }
  0x57   :  { %v2323_v5 = vld [vmem:[#allocation5 + $0x364] ss:$16 sps:$4 sm:$0xff]   ;;  %v2321_v7 = vld [vmem:[#allocation5 + $0x360] ss:$16 sps:$4 sm:$0xff]  }
  0x58   :  { %1246 = vmatpush1.bf16.msra.mxu1 %v2276_v42  ;;  %1287 = vmatpush1.bf16.msra.mxu0 %v2279_v43  ;;  %v2326_v8 = vld [vmem:[#allocation5 + $0x184] ss:$16 sps:$4 sm:$0xff]   ;;  %v2324_v10 = vld [vmem:[#allocation5 + $0x180] ss:$16 sps:$4 sm:$0xff]  }
  0x59   :  { %1247 = vmatprep.subr.bf16.mxu1 %v2284_v44  ;;  %1288 = vmatprep.subr.bf16.mxu0 %v2287_v45  ;;  %v2329_v9 = vld [vmem:[#allocation5 + $0x384] ss:$16 sps:$4 sm:$0xff]   ;;  %v2327_v11 = vld [vmem:[#allocation5 + $0x380] ss:$16 sps:$4 sm:$0xff]  }
  0x5a   :  { %v2332_v12 = vld [vmem:[#allocation5 + $0x1a4] ss:$16 sps:$4 sm:$0xff]   ;;  %v2330_v14 = vld [vmem:[#allocation5 + $0x1a0] ss:$16 sps:$4 sm:$0xff]  }
  0x5b   :  { %v2335_v13 = vld [vmem:[#allocation5 + $0x3a4] ss:$16 sps:$4 sm:$0xff]   ;;  %v2333_v15 = vld [vmem:[#allocation5 + $0x3a0] ss:$16 sps:$4 sm:$0xff]  }
  0x5c   :  { %1248 = vmatpush1.bf16.msra.mxu1 %v2282_v46  ;;  %1289 = vmatpush1.bf16.msra.mxu0 %v2285_v47  ;;  %v2338_v16 = vld [vmem:[#allocation5 + $0x1c4] ss:$16 sps:$4 sm:$0xff]   ;;  %v2336_v17 = vld [vmem:[#allocation5 + $0x1c0] ss:$16 sps:$4 sm:$0xff]  }
  0x5d   :  { %1249 = vmatprep.subr.bf16.mxu1 %v2290_v48  ;;  %1290 = vmatprep.subr.bf16.mxu0 %v2293_v49  ;;  %v2341_v18 = vld [vmem:[#allocation5 + $0x3c4] ss:$16 sps:$4 sm:$0xff]   ;;  %v2339_v19 = vld [vmem:[#allocation5 + $0x3c0] ss:$16 sps:$4 sm:$0xff]  }
  0x5e   :  { %v2344_v20 = vld [vmem:[#allocation5 + $0x1e4] ss:$16 sps:$4 sm:$0xff]   ;;  %v2342_v21 = vld [vmem:[#allocation5 + $0x1e0] ss:$16 sps:$4 sm:$0xff]  }
  0x5f   :  { %v2347_v22 = vld [vmem:[#allocation5 + $0x3e4] ss:$16 sps:$4 sm:$0xff]   ;;  %v2345_v23 = vld [vmem:[#allocation5 + $0x3e0] ss:$16 sps:$4 sm:$0xff]  }
  0x60   :  { %1250 = vmatpush1.bf16.msra.mxu1 %v2288_v50  ;;  %1291 = vmatpush1.bf16.msra.mxu0 %v2291_v51  ;;  %v2020_v30 = vld.sshfl [vmem:[%s2818_s4] sm:$0x33 pattern:$0x75316420] }
  0x61   :  { %1251 = vmatprep.subr.bf16.mxu1 %v2296_v52  ;;  %1292 = vmatprep.subr.bf16.mxu0 %v2299_v53  ;;  %v416_v32 = vcombine.high %v2020_v30, %v2020_v30  ;;  %v423_v33 = vrot.slane %v2020_v30, %v2745_v31  ;;  %v2462_v26 = vld [vmem:[#allocation7 + $0x60] ss:$8 sps:$4 sm:$0xff]   ;;  %v2467_v27 = vld [vmem:[#allocation7 + $0x74] ss:$8 sps:$4 sm:$0xff]  }
  0x62   :  { %v2374_v30 = vld [vmem:[#allocation5 + $0x10c] ss:$16 sps:$4 sm:$0xff]  }
  0x63   :  { %v430_v34 = vrot.slane %v416_v32, %v2745_v31  ;;  %v431_v35 = vcombine.high %v423_v33, %v423_v33  ;;  %v434_v37 = vpack.i.b16 %v423_v33, %v423_v33  ;;  %v2465_v32 = vld [vmem:[#allocation7 + $0x70] ss:$8 sps:$4 sm:$0xff]   ;;  %v2470_v33 = vld [vmem:[#allocation7 + $0x84] ss:$8 sps:$4 sm:$0xff]  }
  0x64   :  { %1252 = vmatpush1.bf16.msra.mxu1 %v2294_v54  ;;  %1293 = vmatpush1.bf16.msra.mxu0 %v2297_v55 }
  0x65   :  { %1253 = vmatprep.subr.bf16.mxu1 %v2302_v56  ;;  %1294 = vmatprep.subr.bf16.mxu0 %v2305_v57  ;;  %v432_v36 = vcombine.high %v430_v34, %v430_v34  ;;  %v448_v39 = vpack.i.b16 %v431_v35, %v431_v35  ;;  %v441_v40 = vpack.i.b16 %v430_v34, %v430_v34  ;;  %v2372_v34 = vld [vmem:[#allocation5 + $0x108] ss:$16 sps:$4 sm:$0xff]   ;;  %v2377_v35 = vld [vmem:[#allocation5 + $0x12c] ss:$16 sps:$4 sm:$0xff]  }
  0x66   :  { %v439_v42 = vrot.slane %v434_v37, %v2750_v38  ;;  %v2473_v37 = vld [vmem:[#allocation7 + $0x94] ss:$8 sps:$4 sm:$0xff]  }
  0x67   :  { %v455_v41 = vpack.i.b16 %v432_v36, %v432_v36  ;;  %v453_v43 = vrot.slane %v448_v39, %v2750_v38  ;;  %v446_v46 = vrot.slane %v441_v40, %v2750_v38  ;;  %v2468_v36 = vld [vmem:[#allocation7 + $0x80] ss:$8 sps:$4 sm:$0xff]   ;;  %v2380_v40 = vld [vmem:[#allocation5 + $0x14c] ss:$16 sps:$4 sm:$0xff]  }
  0x68   :  { %1254 = vmatpush1.bf16.msra.mxu1 %v2300_v58  ;;  %1295 = vmatpush1.bf16.msra.mxu0 %v2303_v59  ;;  %v2621_v58 = vmov 0   ;;  %v2375_v39 = vld [vmem:[#allocation5 + $0x128] ss:$16 sps:$4 sm:$0xff]  }
  0x69   :  { %1255 = vmatprep.subr.bf16.mxu1 %v2308_v60  ;;  %1296 = vmatprep.subr.bf16.mxu0 %v2311_v61  ;;  %v460_v47 = vrot.slane %v455_v41, %v2750_v38  ;;  %v2471_v41 = vld [vmem:[#allocation7 + $0x90] ss:$8 sps:$4 sm:$0xff]  }
  0x6c   :  { %1256 = vmatpush1.bf16.msra.mxu1 %v2306_v62  ;;  %1297 = vmatpush1.bf16.msra.mxu0 %v2309_v63  ;;  %v2348_v62 = vld [vmem:[#allocation5 + $0x8] ss:$16 sps:$4 sm:$0xff]  }
  0x6d   :  { %1257 = vmatprep.subr.bf16.mxu1 %v2314_v0  ;;  %1298 = vmatprep.subr.bf16.mxu0 %v2317_v1  ;;  %v2353_v0 = vld [vmem:[#allocation5 + $0x2c] ss:$16 sps:$4 sm:$0xff]   ;;  %v2444_v1 = vld [vmem:[#allocation7] ss:$8 sps:$4 sm:$0xff]  }
  0x70   :  { %1258 = vmatpush1.bf16.msra.mxu1 %v2312_v2  ;;  %1299 = vmatpush1.bf16.msra.mxu0 %v2315_v3  ;;  %v2446_v2 = vld [vmem:[#allocation7 + $0x4] ss:$8 sps:$4 sm:$0xff]   ;;  %v2351_v3 = vld [vmem:[#allocation5 + $0x28] ss:$16 sps:$4 sm:$0xff]  }
  0x71   :  { %1259 = vmatprep.subr.bf16.mxu1 %v2320_v4  ;;  %1300 = vmatprep.subr.bf16.mxu0 %v2323_v5  ;;  %v2449_v4 = vld [vmem:[#allocation7 + $0x14] ss:$8 sps:$4 sm:$0xff]  }
  0x72   :  { %v2356_v5 = vld [vmem:[#allocation5 + $0x4c] ss:$16 sps:$4 sm:$0xff]  }
  0x74   :  { %1260 = vmatpush1.bf16.msra.mxu1 %v2318_v6  ;;  %1301 = vmatpush1.bf16.msra.mxu0 %v2321_v7  ;;  %v2447_v6 = vld [vmem:[#allocation7 + $0x10] ss:$8 sps:$4 sm:$0xff]   ;;  %v2452_v7 = vld [vmem:[#allocation7 + $0x24] ss:$8 sps:$4 sm:$0xff]  }
  0x75   :  { %1261 = vmatprep.subr.bf16.mxu1 %v2326_v8  ;;  %1302 = vmatprep.subr.bf16.mxu0 %v2329_v9  ;;  %v2354_v8 = vld [vmem:[#allocation5 + $0x48] ss:$16 sps:$4 sm:$0xff]   ;;  %v2359_v9 = vld [vmem:[#allocation5 + $0x6c] ss:$16 sps:$4 sm:$0xff]  }
  0x78   :  { %1262 = vmatpush1.bf16.msra.mxu1 %v2324_v10  ;;  %1303 = vmatpush1.bf16.msra.mxu0 %v2327_v11  ;;  %v2450_v10 = vld [vmem:[#allocation7 + $0x20] ss:$8 sps:$4 sm:$0xff]   ;;  %v2455_v11 = vld [vmem:[#allocation7 + $0x34] ss:$8 sps:$4 sm:$0xff]  }
  0x79   :  { %1263 = vmatprep.subr.bf16.mxu1 %v2332_v12  ;;  %1304 = vmatprep.subr.bf16.mxu0 %v2335_v13  ;;  %v2357_v12 = vld [vmem:[#allocation5 + $0x68] ss:$16 sps:$4 sm:$0xff]   ;;  %v2362_v13 = vld [vmem:[#allocation5 + $0x8c] ss:$16 sps:$4 sm:$0xff]  }
  0x7c   :  { %1264 = vmatpush1.bf16.msra.mxu1 %v2330_v14  ;;  %1305 = vmatpush1.bf16.msra.mxu0 %v2333_v15  ;;  %v2453_v14 = vld [vmem:[#allocation7 + $0x30] ss:$8 sps:$4 sm:$0xff]   ;;  %v2458_v15 = vld [vmem:[#allocation7 + $0x44] ss:$8 sps:$4 sm:$0xff]  }
  0x7d   :  { %1265 = vmatprep.subr.bf16.mxu1 %v2338_v16  ;;  %1306 = vmatprep.subr.bf16.mxu0 %v2341_v18  ;;  %v2360_v16 = vld [vmem:[#allocation5 + $0x88] ss:$16 sps:$4 sm:$0xff]  }
  0x7e   :  { %v2456_v18 = vld [vmem:[#allocation7 + $0x40] ss:$8 sps:$4 sm:$0xff]  }
  0x80   :  { %1266 = vmatpush1.bf16.msra.mxu1 %v2336_v17  ;;  %1307 = vmatpush1.bf16.msra.mxu0 %v2339_v19  ;;  %v2365_v17 = vld [vmem:[#allocation5 + $0xac] ss:$16 sps:$4 sm:$0xff]  }
  0x81   :  { %1267 = vmatprep.subr.bf16.mxu1 %v2344_v20  ;;  %1308 = vmatprep.subr.bf16.mxu0 %v2347_v22  ;;  %v2461_v19 = vld [vmem:[#allocation7 + $0x54] ss:$8 sps:$4 sm:$0xff]   ;;  %v2363_v20 = vld [vmem:[#allocation5 + $0xa8] ss:$16 sps:$4 sm:$0xff]  }
  0x82   :  { %v2459_v22 = vld [vmem:[#allocation7 + $0x50] ss:$8 sps:$4 sm:$0xff]  }
  0x84   :  { %1268 = vmatpush1.bf16.msra.mxu1 %v2342_v21  ;;  %1309 = vmatpush1.bf16.msra.mxu0 %v2345_v23  ;;  %v2368_v21 = vld [vmem:[#allocation5 + $0xcc] ss:$16 sps:$4 sm:$0xff]  }
  0x85   :  { %1319 = vmatprep.subr.bf16.mxu1 %v2350_v24  ;;  %1851 = vmatprep.subr.bf16.mxu0 %v2446_v2  ;;  %v2464_v23 = vld [vmem:[#allocation7 + $0x64] ss:$8 sps:$4 sm:$0xff]   ;;  %v2366_v24 = vld [vmem:[#allocation5 + $0xc8] ss:$16 sps:$4 sm:$0xff]  }
  0x86   :  { %v2396_v2 = vld [vmem:[#allocation5 + $0x208] ss:$16 sps:$4 sm:$0xff]  }
 0x11a   :  { %v327_v44 = vpop.f32.mrb[0].mxu0  ;;  %v398_v45 = vpop.f32.mrb[0].mxu1 }
 0x11b   :  { %v403_v48 = vpack.c.bf16 %v327_v44, %v327_v44  ;;  %v405_v49 = vpack.c.bf16 %v398_v45, %v398_v45  ;;  %v329_v50 = vpop.f32.mrb[1].mxu0  ;;  %v400_v51 = vpop.f32.mrb[1].mxu1  ;;  %v2383_v44 = vld [vmem:[#allocation5 + $0x16c] ss:$16 sps:$4 sm:$0xff]   ;;  %v2474_v45 = vld [vmem:[#allocation7 + $0xa0] ss:$8 sps:$4 sm:$0xff]  }
 0x11c   :  { %v404_v52 = vpack.c.bf16 %v329_v50, %v329_v50  ;;  %v406_v53 = vpack.c.bf16 %v400_v51, %v400_v51  ;;  %v2482_v50 = vld [vmem:[#allocation7 + $0xc4] ss:$8 sps:$4 sm:$0xff]   ;;  %v2384_v51 = vld [vmem:[#allocation5 + $0x188] ss:$16 sps:$4 sm:$0xff]  }
 0x11d   :  { %v461_v54 = vadd.bf16 %v439_v42, %v403_v48  ;;  %v463_v55 = vadd.bf16 %v453_v43, %v405_v49  ;;  %v2476_v42 = vld [vmem:[#allocation7 + $0xa4] ss:$8 sps:$4 sm:$0xff]   ;;  %v2378_v43 = vld [vmem:[#allocation5 + $0x148] ss:$16 sps:$4 sm:$0xff]  }
 0x11e   :  { %v462_v56 = vadd.bf16 %v446_v46, %v404_v52  ;;  %v464_v57 = vadd.bf16 %v460_v47, %v406_v53  ;;  %v2479_v46 = vld [vmem:[#allocation7 + $0xb4] ss:$8 sps:$4 sm:$0xff]   ;;  %v2381_v47 = vld [vmem:[#allocation5 + $0x168] ss:$16 sps:$4 sm:$0xff]  }
 0x11f   :  { %v2757_v59 = vmax.bf16 %v2621_v58, %v463_v55  ;;  %v2764_v63 = vmax.bf16 %v2621_v58, %v461_v54  ;;  %v2386_v48 = vld [vmem:[#allocation5 + $0x18c] ss:$16 sps:$4 sm:$0xff]   ;;  %v2477_v49 = vld [vmem:[#allocation7 + $0xb0] ss:$8 sps:$4 sm:$0xff]   ;;  %v2480_v53 = vld [vmem:[#allocation7 + $0xc0] ss:$8 sps:$4 sm:$0xff]  }
 0x120   :  { %v466_v60 = vmax.bf16 %v2621_v58, %v462_v56  ;;  %v2761_v61 = vmax.bf16 %v2621_v58, %v464_v57  ;;  %v2389_v52 = vld [vmem:[#allocation5 + $0x1ac] ss:$16 sps:$4 sm:$0xff]   ;;  %v2387_v55 = vld [vmem:[#allocation5 + $0x1a8] ss:$16 sps:$4 sm:$0xff]  }
 0x121   :  { %v2485_v54 = vld [vmem:[#allocation7 + $0xd4] ss:$8 sps:$4 sm:$0xff]   ;;  %v2483_v57 = vld [vmem:[#allocation7 + $0xd0] ss:$8 sps:$4 sm:$0xff]  }
 0x122   :  { %1269 = vmatprep.mubr.bf16.mxu1 %v466_v60  ;;  %1310 = vmatprep.mubr.bf16.mxu0 %v2761_v61  ;;  %v2392_v56 = vld [vmem:[#allocation5 + $0x1cc] ss:$16 sps:$4 sm:$0xff]  }
 0x123   :  { %1270 = vmatmul.mubr.bf16.vlgmr.msra.gmra.mrb[4].mxu1 %v2764_v63  ;;  %1311 = vmatmul.mubr.bf16.vlgmr.msra.gmra.mrb[4].mxu0 %v2757_v59 }
 0x124   :  { %1320 = vmatpush1.bf16.msra.mxu1 %v2348_v62  ;;  %1351 = vmatprep.mubr.bf16.mxu1 %v466_v60  ;;  %v2390_v60 = vld [vmem:[#allocation5 + $0x1c8] ss:$16 sps:$4 sm:$0xff]   ;;  %v2395_v62 = vld [vmem:[#allocation5 + $0x1ec] ss:$16 sps:$4 sm:$0xff]  }
 0x125   :  { %1321 = vmatprep.subr.bf16.mxu1 %v2353_v0  ;;  %1852 = vmatpush1.bf16.msra.mxu0 %v2444_v1  ;;  %v2393_v0 = vld [vmem:[#allocation5 + $0x1e8] ss:$16 sps:$4 sm:$0xff]   ;;  %v2398_v1 = vld [vmem:[#allocation5 + $0x20c] ss:$16 sps:$4 sm:$0xff]  }
 0x126   :  { %1853 = vmatprep.subr.bf16.mxu0 %v2449_v4  ;;  %v2399_v4 = vld [vmem:[#allocation5 + $0x228] ss:$16 sps:$4 sm:$0xff]  }
 0x128   :  { %1322 = vmatpush1.bf16.msra.mxu1 %v2351_v3  ;;  %v2401_v3 = vld [vmem:[#allocation5 + $0x22c] ss:$16 sps:$4 sm:$0xff]  }
 0x129   :  { %1323 = vmatprep.subr.bf16.mxu1 %v2356_v5  ;;  %1854 = vmatpush1.bf16.msra.mxu0 %v2447_v6  ;;  %v2404_v5 = vld [vmem:[#allocation5 + $0x24c] ss:$16 sps:$4 sm:$0xff]   ;;  %v2402_v6 = vld [vmem:[#allocation5 + $0x248] ss:$16 sps:$4 sm:$0xff]  }
 0x12a   :  { %1855 = vmatprep.subr.bf16.mxu0 %v2452_v7  ;;  %v2407_v7 = vld [vmem:[#allocation5 + $0x26c] ss:$16 sps:$4 sm:$0xff]  }
 0x12c   :  { %1324 = vmatpush1.bf16.msra.mxu1 %v2354_v8  ;;  %v2405_v8 = vld [vmem:[#allocation5 + $0x268] ss:$16 sps:$4 sm:$0xff]  }
 0x12d   :  { %1325 = vmatprep.subr.bf16.mxu1 %v2359_v9  ;;  %1856 = vmatpush1.bf16.msra.mxu0 %v2450_v10  ;;  %v2410_v9 = vld [vmem:[#allocation5 + $0x28c] ss:$16 sps:$4 sm:$0xff]   ;;  %v2408_v10 = vld [vmem:[#allocation5 + $0x288] ss:$16 sps:$4 sm:$0xff]  }
 0x12e   :  { %1857 = vmatprep.subr.bf16.mxu0 %v2455_v11  ;;  %v2413_v11 = vld [vmem:[#allocation5 + $0x2ac] ss:$16 sps:$4 sm:$0xff]  }
 0x130   :  { %1326 = vmatpush1.bf16.msra.mxu1 %v2357_v12  ;;  %v2416_v12 = vld [vmem:[#allocation5 + $0x2cc] ss:$16 sps:$4 sm:$0xff]  }
 0x131   :  { %1327 = vmatprep.subr.bf16.mxu1 %v2362_v13  ;;  %1858 = vmatpush1.bf16.msra.mxu0 %v2453_v14  ;;  %v2488_v13 = vld [vmem:[#allocation7 + $0xe4] ss:$8 sps:$4 sm:$0xff]  }
 0x132   :  { %1859 = vmatprep.subr.bf16.mxu0 %v2458_v15  ;;  %v2419_v14 = vld [vmem:[#allocation5 + $0x2ec] ss:$16 sps:$4 sm:$0xff]   ;;  %v2486_v15 = vld [vmem:[#allocation7 + $0xe0] ss:$8 sps:$4 sm:$0xff]  }
 0x134   :  { %1328 = vmatpush1.bf16.msra.mxu1 %v2360_v16  ;;  %v2417_v16 = vld [vmem:[#allocation5 + $0x2e8] ss:$16 sps:$4 sm:$0xff]  }
 0x135   :  { %1329 = vmatprep.subr.bf16.mxu1 %v2365_v17  ;;  %1860 = vmatpush1.bf16.msra.mxu0 %v2456_v18  ;;  %v2491_v17 = vld [vmem:[#allocation7 + $0xf4] ss:$8 sps:$4 sm:$0xff]  }
 0x136   :  { %1861 = vmatprep.subr.bf16.mxu0 %v2461_v19  ;;  %v2422_v18 = vld [vmem:[#allocation5 + $0x30c] ss:$16 sps:$4 sm:$0xff]   ;;  %v2489_v19 = vld [vmem:[#allocation7 + $0xf0] ss:$8 sps:$4 sm:$0xff]  }
 0x138   :  { %1330 = vmatpush1.bf16.msra.mxu1 %v2363_v20  ;;  %v2420_v20 = vld [vmem:[#allocation5 + $0x308] ss:$16 sps:$4 sm:$0xff]  }
 0x139   :  { %1331 = vmatprep.subr.bf16.mxu1 %v2368_v21  ;;  %1862 = vmatpush1.bf16.msra.mxu0 %v2459_v22  ;;  %v2425_v21 = vld [vmem:[#allocation5 + $0x32c] ss:$16 sps:$4 sm:$0xff]  }
 0x13a   :  { %1863 = vmatprep.subr.bf16.mxu0 %v2464_v23  ;;  %v2494_v22 = vld [vmem:[#allocation7 + $0x104] ss:$8 sps:$4 sm:$0xff]   ;;  %v2423_v23 = vld [vmem:[#allocation5 + $0x328] ss:$16 sps:$4 sm:$0xff]  }
 0x13c   :  { %1332 = vmatpush1.bf16.msra.mxu1 %v2366_v24  ;;  %v2428_v24 = vld [vmem:[#allocation5 + $0x34c] ss:$16 sps:$4 sm:$0xff]  }
 0x13d   :  { %1333 = vmatprep.subr.bf16.mxu1 %v2371_v25  ;;  %1864 = vmatpush1.bf16.msra.mxu0 %v2462_v26  ;;  %v2426_v25 = vld [vmem:[#allocation5 + $0x348] ss:$16 sps:$4 sm:$0xff]   ;;  %v2431_v26 = vld [vmem:[#allocation5 + $0x36c] ss:$16 sps:$4 sm:$0xff]  }
 0x13e   :  { %1865 = vmatprep.subr.bf16.mxu0 %v2467_v27  ;;  %v2429_v27 = vld [vmem:[#allocation5 + $0x368] ss:$16 sps:$4 sm:$0xff]  }
 0x140   :  { %1334 = vmatpush1.bf16.msra.mxu1 %v2369_v28  ;;  %v2434_v28 = vld [vmem:[#allocation5 + $0x38c] ss:$16 sps:$4 sm:$0xff]  }
 0x141   :  { %1335 = vmatprep.subr.bf16.mxu1 %v2374_v30  ;;  %1866 = vmatpush1.bf16.msra.mxu0 %v2465_v32  ;;  %v2432_v30 = vld [vmem:[#allocation5 + $0x388] ss:$16 sps:$4 sm:$0xff]   ;;  %v2437_v32 = vld [vmem:[#allocation5 + $0x3ac] ss:$16 sps:$4 sm:$0xff]  }
 0x142   :  { %1867 = vmatprep.subr.bf16.mxu0 %v2470_v33  ;;  %v2435_v33 = vld [vmem:[#allocation5 + $0x3a8] ss:$16 sps:$4 sm:$0xff]  }
 0x144   :  { %1336 = vmatpush1.bf16.msra.mxu1 %v2372_v34  ;;  %v2440_v34 = vld [vmem:[#allocation5 + $0x3cc] ss:$16 sps:$4 sm:$0xff]  }
 0x145   :  { %1337 = vmatprep.subr.bf16.mxu1 %v2377_v35  ;;  %1868 = vmatpush1.bf16.msra.mxu0 %v2468_v36  ;;  %v2438_v35 = vld [vmem:[#allocation5 + $0x3c8] ss:$16 sps:$4 sm:$0xff]   ;;  %v2443_v36 = vld [vmem:[#allocation5 + $0x3ec] ss:$16 sps:$4 sm:$0xff]  }
 0x146   :  { %1869 = vmatprep.subr.bf16.mxu0 %v2473_v37  ;;  %v2441_v37 = vld [vmem:[#allocation5 + $0x3e8] ss:$16 sps:$4 sm:$0xff]  }
 0x148   :  { %1338 = vmatpush1.bf16.msra.mxu1 %v2375_v39  ;;  %v2149_v39 = vld.sshfl [vmem:[%s2820_s6] sm:$0x33 pattern:$0x75316420] }
 0x149   :  { %1339 = vmatprep.subr.bf16.mxu1 %v2380_v40  ;;  %1870 = vmatpush1.bf16.msra.mxu0 %v2471_v41  ;;  %v1414_v40 = vcombine.high %v2149_v39, %v2149_v39  ;;  %v2776_v41 = vrot.slane %v2149_v39, %v2745_v31 }
 0x14a   :  { %1871 = vmatprep.subr.bf16.mxu0 %v2476_v42 }
 0x14b   :  { %v2779_v42 = vrot.slane %v1414_v40, %v2745_v31 }
 0x14c   :  { %1340 = vmatpush1.bf16.msra.mxu1 %v2378_v43  ;;  %v1432_v43 = vpack.i.b16 %v2776_v41, %v2776_v41 }
 0x14d   :  { %1341 = vmatprep.subr.bf16.mxu1 %v2383_v44  ;;  %1872 = vmatpush1.bf16.msra.mxu0 %v2474_v45  ;;  %v1439_v44 = vpack.i.b16 %v2779_v42, %v2779_v42 }
 0x14e   :  { %1873 = vmatprep.subr.bf16.mxu0 %v2479_v46 }
 0x150   :  { %1342 = vmatpush1.bf16.msra.mxu1 %v2381_v47  ;;  %v1437_v47 = vrot.slane %v1432_v43, %v2750_v38 }
 0x151   :  { %1343 = vmatprep.subr.bf16.mxu1 %v2386_v48  ;;  %1874 = vmatpush1.bf16.msra.mxu0 %v2477_v49 }
 0x152   :  { %1875 = vmatprep.subr.bf16.mxu0 %v2482_v50 }
 0x154   :  { %1344 = vmatpush1.bf16.msra.mxu1 %v2384_v51  ;;  %v1444_v51 = vrot.slane %v1439_v44, %v2750_v38 }
 0x155   :  { %1345 = vmatprep.subr.bf16.mxu1 %v2389_v52  ;;  %1876 = vmatpush1.bf16.msra.mxu0 %v2480_v53 }
 0x156   :  { %1877 = vmatprep.subr.bf16.mxu0 %v2485_v54 }
 0x158   :  { %1346 = vmatpush1.bf16.msra.mxu1 %v2387_v55 }
 0x159   :  { %1347 = vmatprep.subr.bf16.mxu1 %v2392_v56  ;;  %1878 = vmatpush1.bf16.msra.mxu0 %v2483_v57 }
 0x15a   :  { %1879 = vmatprep.subr.bf16.mxu0 %v2488_v13  ;;  %v2515_v13 = vld [vmem:[#allocation7 + $0x174] ss:$8 sps:$4 sm:$0xff]  }
 0x15c   :  { %1348 = vmatpush1.bf16.msra.mxu1 %v2390_v60 }
 0x15d   :  { %1349 = vmatprep.subr.bf16.mxu1 %v2395_v62  ;;  %1880 = vmatpush1.bf16.msra.mxu0 %v2486_v15  ;;  %v2518_v15 = vld [vmem:[#allocation7 + $0x184] ss:$8 sps:$4 sm:$0xff]  }
 0x15e   :  { %1881 = vmatprep.subr.bf16.mxu0 %v2491_v17  ;;  %v2521_v17 = vld [vmem:[#allocation7 + $0x194] ss:$8 sps:$4 sm:$0xff]  }
 0x160   :  { %1350 = vmatpush1.bf16.msra.mxu1 %v2393_v0 }
 0x161   :  { %1360 = vmatprep.subr.bf16.mxu1 %v2398_v1  ;;  %1882 = vmatpush1.bf16.msra.mxu0 %v2489_v19  ;;  %v2492_v1 = vld [vmem:[#allocation7 + $0x100] ss:$8 sps:$4 sm:$0xff]   ;;  %v2524_v19 = vld [vmem:[#allocation7 + $0x1a4] ss:$8 sps:$4 sm:$0xff]  }
 0x162   :  { %1892 = vmatprep.subr.bf16.mxu0 %v2494_v22  ;;  %v2525_v22 = vld [vmem:[#allocation7 + $0x1b0] ss:$8 sps:$4 sm:$0xff]  }
 0x163   :  { %1352 = vmatmul.mubr.bf16.vlgmr.msra.gmra.mrb[8].mxu1 %v2764_v63  ;;  %v2411_v63 = vld [vmem:[#allocation5 + $0x2a8] ss:$16 sps:$4 sm:$0xff]  }
 0x164   :  { %1361 = vmatpush1.bf16.msra.mxu1 %v2396_v2  ;;  %1392 = vmatprep.mubr.bf16.mxu1 %v2761_v61  ;;  %v2414_v61 = vld [vmem:[#allocation5 + $0x2c8] ss:$16 sps:$4 sm:$0xff]  }
 0x165   :  { %1362 = vmatprep.subr.bf16.mxu1 %v2401_v3  ;;  %v2497_v3 = vld [vmem:[#allocation7 + $0x114] ss:$8 sps:$4 sm:$0xff]  }
 0x168   :  { %1363 = vmatpush1.bf16.msra.mxu1 %v2399_v4  ;;  %v2495_v4 = vld [vmem:[#allocation7 + $0x110] ss:$8 sps:$4 sm:$0xff]  }
 0x169   :  { %1364 = vmatprep.subr.bf16.mxu1 %v2404_v5  ;;  %v2500_v5 = vld [vmem:[#allocation7 + $0x124] ss:$8 sps:$4 sm:$0xff]  }
 0x16c   :  { %1365 = vmatpush1.bf16.msra.mxu1 %v2402_v6  ;;  %v2498_v6 = vld [vmem:[#allocation7 + $0x120] ss:$8 sps:$4 sm:$0xff]  }
 0x16d   :  { %1366 = vmatprep.subr.bf16.mxu1 %v2407_v7  ;;  %v2503_v7 = vld [vmem:[#allocation7 + $0x134] ss:$8 sps:$4 sm:$0xff]  }
 0x170   :  { %1367 = vmatpush1.bf16.msra.mxu1 %v2405_v8  ;;  %v2501_v8 = vld [vmem:[#allocation7 + $0x130] ss:$8 sps:$4 sm:$0xff]  }
 0x171   :  { %1368 = vmatprep.subr.bf16.mxu1 %v2410_v9  ;;  %v2506_v9 = vld [vmem:[#allocation7 + $0x144] ss:$8 sps:$4 sm:$0xff]  }
 0x174   :  { %1369 = vmatpush1.bf16.msra.mxu1 %v2408_v10  ;;  %v2504_v10 = vld [vmem:[#allocation7 + $0x140] ss:$8 sps:$4 sm:$0xff]  }
 0x175   :  { %1370 = vmatprep.subr.bf16.mxu1 %v2413_v11  ;;  %v2509_v11 = vld [vmem:[#allocation7 + $0x154] ss:$8 sps:$4 sm:$0xff]  }
 0x178   :  { %1371 = vmatpush1.bf16.msra.mxu1 %v2411_v63  ;;  %v2507_v63 = vld [vmem:[#allocation7 + $0x150] ss:$8 sps:$4 sm:$0xff]  }
 0x179   :  { %1372 = vmatprep.subr.bf16.mxu1 %v2416_v12  ;;  %v2512_v12 = vld [vmem:[#allocation7 + $0x164] ss:$8 sps:$4 sm:$0xff]  }
 0x17c   :  { %1373 = vmatpush1.bf16.msra.mxu1 %v2414_v61  ;;  %v2510_v61 = vld [vmem:[#allocation7 + $0x160] ss:$8 sps:$4 sm:$0xff]  }
 0x17d   :  { %1374 = vmatprep.subr.bf16.mxu1 %v2419_v14  ;;  %v2513_v14 = vld [vmem:[#allocation7 + $0x170] ss:$8 sps:$4 sm:$0xff]  }
 0x180   :  { %1375 = vmatpush1.bf16.msra.mxu1 %v2417_v16  ;;  %v2516_v16 = vld [vmem:[#allocation7 + $0x180] ss:$8 sps:$4 sm:$0xff]  }
 0x181   :  { %1376 = vmatprep.subr.bf16.mxu1 %v2422_v18  ;;  %v2519_v18 = vld [vmem:[#allocation7 + $0x190] ss:$8 sps:$4 sm:$0xff]  }
 0x184   :  { %1377 = vmatpush1.bf16.msra.mxu1 %v2420_v20  ;;  %v2522_v20 = vld [vmem:[#allocation7 + $0x1a0] ss:$8 sps:$4 sm:$0xff]  }
 0x185   :  { %1378 = vmatprep.subr.bf16.mxu1 %v2425_v21  ;;  %v2527_v21 = vld [vmem:[#allocation7 + $0x1b4] ss:$8 sps:$4 sm:$0xff]  }
 0x188   :  { %1379 = vmatpush1.bf16.msra.mxu1 %v2423_v23  ;;  %v2530_v23 = vld [vmem:[#allocation7 + $0x1c4] ss:$8 sps:$4 sm:$0xff]  }
 0x189   :  { %1380 = vmatprep.subr.bf16.mxu1 %v2428_v24  ;;  %v2528_v24 = vld [vmem:[#allocation7 + $0x1c0] ss:$8 sps:$4 sm:$0xff]  }
 0x18c   :  { %1381 = vmatpush1.bf16.msra.mxu1 %v2426_v25  ;;  %v2533_v25 = vld [vmem:[#allocation7 + $0x1d4] ss:$8 sps:$4 sm:$0xff]  }
 0x18d   :  { %1382 = vmatprep.subr.bf16.mxu1 %v2431_v26  ;;  %v2531_v26 = vld [vmem:[#allocation7 + $0x1d0] ss:$8 sps:$4 sm:$0xff]  }
 0x190   :  { %1383 = vmatpush1.bf16.msra.mxu1 %v2429_v27  ;;  %v2536_v27 = vld [vmem:[#allocation7 + $0x1e4] ss:$8 sps:$4 sm:$0xff]  }
 0x191   :  { %1384 = vmatprep.subr.bf16.mxu1 %v2434_v28  ;;  %v2534_v28 = vld [vmem:[#allocation7 + $0x1e0] ss:$8 sps:$4 sm:$0xff]  }
 0x194   :  { %1385 = vmatpush1.bf16.msra.mxu1 %v2432_v30  ;;  %v2539_v30 = vld [vmem:[#allocation7 + $0x1f4] ss:$8 sps:$4 sm:$0xff]  }
 0x195   :  { %1386 = vmatprep.subr.bf16.mxu1 %v2437_v32  ;;  %v2537_v32 = vld [vmem:[#allocation7 + $0x1f0] ss:$8 sps:$4 sm:$0xff]  }
 0x198   :  { %1387 = vmatpush1.bf16.msra.mxu1 %v2435_v33  ;;  %v1429_v33 = vcombine.high %v2776_v41, %v2776_v41 }
 0x199   :  { %1388 = vmatprep.subr.bf16.mxu1 %v2440_v34  ;;  %v1430_v34 = vcombine.high %v2779_v42, %v2779_v42  ;;  %v2214_v42 = vld.sshfl [vmem:[%s2822_s8] sm:$0x11 pattern:$0x75316420] }
 0x19c   :  { %1389 = vmatpush1.bf16.msra.mxu1 %v2438_v35  ;;  %v1446_v35 = vpack.i.b16 %v1429_v33, %v1429_v33 }
 0x19d   :  { %1390 = vmatprep.subr.bf16.mxu1 %v2443_v36  ;;  %v1453_v36 = vpack.i.b16 %v1430_v34, %v1430_v34 }
 0x19f   :  { %v1458_v40 = vrot.slane %v1453_v36, %v2750_v38 }
 0x1a0   :  { %1391 = vmatpush1.bf16.msra.mxu1 %v2441_v37  ;;  %v1451_v37 = vrot.slane %v1446_v35, %v2750_v38 }
 0x1a3   :  { %1393 = vmatmul.mubr.bf16.vlgmr.msra.gmra.mrb[8].mxu1 %v2757_v59 }
 0x1f6   :  { %v1271_v45 = vpop.f32.mrb[4].mxu1  ;;  %v1312_v46 = vpop.f32.mrb[4].mxu0 }
 0x1f7   :  { %v1313_v59 = vadd.f32 %v1312_v46, %v1271_v45  ;;  %v1273_v48 = vpop.f32.mrb[5].mxu1  ;;  %v1314_v49 = vpop.f32.mrb[5].mxu0 }
 0x1f8   :  { %v1315_v50 = vadd.f32 %v1314_v49, %v1273_v48  ;;  %v1275_v52 = vpop.f32.mrb[6].mxu1  ;;  %v1316_v53 = vpop.f32.mrb[6].mxu0 }
 0x1f9   :  { %v1401_v54 = vpack.c.bf16 %v1313_v59, %v1313_v59  ;;  %v1276_v55 = vpop.f32.mrb[7].mxu1  ;;  %v1317_v56 = vpop.f32.mrb[7].mxu0 }
 0x1fa   :  { %v1402_v57 = vpack.c.bf16 %v1315_v50, %v1315_v50  ;;  %v1944_v50 = vcombine.high %v2214_v42, %v2214_v42 }
 0x1fb   :  { %v1459_v60 = vadd.bf16 %v1437_v47, %v1401_v54 }
 0x1fc   :  { %v1460_v62 = vadd.bf16 %v1444_v51, %v1402_v57  ;;  %v1951_v51 = vrot.slane %v2214_v42, %v2745_v31  ;;  %v1958_v52 = vrot.slane %v1944_v50, %v2745_v31 }
 0x1fd   :  { %v1463_v2 = vmax.bf16 %v2621_v58, %v1459_v60 }
 0x1fe   :  { %v1464_v0 = vmax.bf16 %v2621_v58, %v1460_v62  ;;  %v1960_v53 = vpack.i.b16 %v1951_v51, %v1951_v51  ;;  %v1967_v54 = vpack.i.b16 %v1958_v52, %v1958_v52 }
 0x200   :  { %1883 = vmatprep.mubr.bf16.mxu0 %v1464_v0  ;;  %v1965_v55 = vrot.slane %v1960_v53, %v2750_v38  ;;  %v1972_v57 = vrot.slane %v1967_v54, %v2750_v38 }
 0x201   :  { %1884 = vmatmul.mubr.bf16.vlgmr.msra.gmra.mrb[8].mxu0 %v1463_v2  ;;  %v1979_v2 = vld [vmem:[%s2823_s9] sm:$0x3] }
 0x202   :  { %1893 = vmatpush1.bf16.msra.mxu0 %v2492_v1 }
 0x203   :  { %1894 = vmatprep.subr.bf16.mxu0 %v2497_v3  ;;  %v1987_v3 = vsub.s32 1, %v2739_v29 }
 0x206   :  { %1895 = vmatpush1.bf16.msra.mxu0 %v2495_v4 }
 0x207   :  { %1896 = vmatprep.subr.bf16.mxu0 %v2500_v5 }
 0x20a   :  { %1897 = vmatpush1.bf16.msra.mxu0 %v2498_v6 }
 0x20b   :  { %1898 = vmatprep.subr.bf16.mxu0 %v2503_v7  ;;  %v1984_v7 = vrot.slane %v1979_v2, %v2750_v38 }
 0x20e   :  { %1899 = vmatpush1.bf16.msra.mxu0 %v2501_v8 }
 0x20f   :  { %1900 = vmatprep.subr.bf16.mxu0 %v2506_v9  ;;  %v1988_v9 = vrot.slane %v1979_v2, %v1987_v3 }
 0x212   :  { %1901 = vmatpush1.bf16.msra.mxu0 %v2504_v10 }
 0x213   :  { %1902 = vmatprep.subr.bf16.mxu0 %v2509_v11 }
 0x216   :  { %1903 = vmatpush1.bf16.msra.mxu0 %v2507_v63 }
 0x217   :  { %1904 = vmatprep.subr.bf16.mxu0 %v2512_v12 }
 0x21a   :  { %1905 = vmatpush1.bf16.msra.mxu0 %v2510_v61 }
 0x21b   :  { %1906 = vmatprep.subr.bf16.mxu0 %v2515_v13  ;;  %v2215_v13 = vld [vmem:[#allocation2] ss:$0 sm:$0xff] }
 0x21e   :  { %1907 = vmatpush1.bf16.msra.mxu0 %v2513_v14 }
 0x21f   :  { %1908 = vmatprep.subr.bf16.mxu0 %v2518_v15 }
 0x222   :  { %1909 = vmatpush1.bf16.msra.mxu0 %v2516_v16 }
 0x223   :  { %1910 = vmatprep.subr.bf16.mxu0 %v2521_v17 }
 0x226   :  { %1911 = vmatpush1.bf16.msra.mxu0 %v2519_v18 }
 0x227   :  { %1912 = vmatprep.subr.bf16.mxu0 %v2524_v19 }
 0x22a   :  { %1913 = vmatpush1.bf16.msra.mxu0 %v2522_v20 }
 0x22b   :  { %1914 = vmatprep.subr.bf16.mxu0 %v2527_v21 }
 0x22e   :  { %1915 = vmatpush1.bf16.msra.mxu0 %v2525_v22 }
 0x22f   :  { %1916 = vmatprep.subr.bf16.mxu0 %v2530_v23 }
 0x232   :  { %1917 = vmatpush1.bf16.msra.mxu0 %v2528_v24 }
 0x233   :  { %1918 = vmatprep.subr.bf16.mxu0 %v2533_v25 }
 0x236   :  { %1919 = vmatpush1.bf16.msra.mxu0 %v2531_v26 }
 0x237   :  { %1920 = vmatprep.subr.bf16.mxu0 %v2536_v27 }
 0x23a   :  { %1921 = vmatpush1.bf16.msra.mxu0 %v2534_v28 }
 0x23b   :  { %1922 = vmatprep.subr.bf16.mxu0 %v2539_v30 }
 0x23e   :  { %1923 = vmatpush1.bf16.msra.mxu0 %v2537_v32 }
 0x276   :  { %v1394_v39 = vpop.f32.mrb[8].mxu1 }
 0x277   :  { %v1403_v43 = vpack.c.bf16 %v1394_v39, %v1394_v39  ;;  %v1396_v44 = vpop.f32.mrb[9].mxu1 }
 0x278   :  { %v1404_v45 = vpack.c.bf16 %v1396_v44, %v1396_v44  ;;  %v1398_v46 = vpop.f32.mrb[10].mxu1 }
 0x279   :  { %v1461_v59 = vadd.bf16 %v1451_v37, %v1403_v43  ;;  %v1399_v47 = vpop.f32.mrb[11].mxu1 }
 0x27a   :  { %v1462_v48 = vadd.bf16 %v1458_v40, %v1404_v45 }
 0x27b   :  { %v1465_v41 = vmax.bf16 %v2621_v58, %v1461_v59 }
 0x27c   :  { %v1466_v49 = vmax.bf16 %v2621_v58, %v1462_v48 }
 0x27e   :  { %1924 = vmatprep.mubr.bf16.mxu0 %v1466_v49 }
 0x27f   :  { %1925 = vmatmul.mubr.bf16.vlgmr.msra.gmra.mrb[8].mxu0 %v1465_v41 }
 0x352   :  { %v1926_v56 = vpop.f32.mrb[8].mxu0 }
 0x353   :  { %v1933_v60 = vpack.c.bf16 %v1926_v56, %v1926_v56  ;;  %v1928_v62 = vpop.f32.mrb[9].mxu0 }
 0x354   :  { %v1934_v0 = vpack.c.bf16 %v1928_v62, %v1928_v62  ;;  %v1930_v1 = vpop.f32.mrb[10].mxu0 }
 0x355   :  { %v1973_v4 = vadd.bf16 %v1965_v55, %v1933_v60  ;;  %v1931_v5 = vpop.f32.mrb[11].mxu0 }
 0x356   :  { %v1974_v31 = vadd.bf16 %v1972_v57, %v1934_v0 }
 0x357   :  { %v1975_v6 = vmax.bf16 %v2621_v58, %v1973_v4 }
 0x358   :  { %v1976_v8 = vmax.bf16 %v2621_v58, %v1974_v31 }
 0x359   :  { %v1977_v10 = vunpack.c.l.bf16 %v1975_v6 }
 0x35a   :  { %v1978_v11 = vunpack.c.l.bf16 %v1976_v8 }
 0x35b   :  { %v1991_v63 = vmul.f32 %v1984_v7, %v1977_v10 }
 0x35c   :  { %v1992_v12 = vmul.f32 %v1988_v9, %v1978_v11 }
 0x35e   :  { %v1993_v61 = vadd.f32 %v1992_v12, %v1991_v63 }
 0x360   :  { %1994 = vadd.xlane.f32.xlu0 %v1993_v61 }
 0x3ed   :  { %v1995_v14 = vpop.xlane.xlu0 %1994 }
 0x3ee   :  { %v2003_v29 = vadd.f32 %v2215_v13, %v1995_v14 }
 0x3f0   :  { %2005 = vst.msk [vmem:[%s2825_s11] sm:$0xff] %vm2004_vm3, %v2003_v29 }
 0x3f1   :  { %2010 = vsyncpa [#allocation4], 1 }
 0x3f2   :  { %2011 = vsyncpa [#allocation6], 1 }

</bundles_post_ra>
